<compile_context>
chip_gen: v6e
topology: v6e:2x2x1
jax: 0.10.0
libtpu: 0.0.40
codegen_flags: <defaults>
</compile_context>

<pallas_src>
import jax
import jax.numpy as jnp
from jax.experimental import pallas as pl
from jax.experimental.pallas import tpu as pltpu


def _hotcold2_kernel(x_ref, w1_ref, b1_ref, w2_ref, b2_ref, o_ref):
    # x_ref:  VMEM (C, TB) f32, batch on the lane axis
    # w1_ref: SMEM (C*H,)   f32, w1_ref[c*H + j] = W1[c, j]
    # b1_ref: SMEM (H,)     f32
    # w2_ref: SMEM (H,)     f32
    # b2_ref: SMEM (1,)     f32
    # o_ref:  VMEM (1, TB)  f32, lane-dense output slab
    C, TB = x_ref.shape
    H = b1_ref.shape[0]

    x = x_ref[...]                                    # (C, TB)
    xs = [x[c:c + 1, :] for c in range(C)]            # hoisted row views, (1, TB) each

    y = jnp.full((1, TB), b2_ref[0], jnp.float32)     # start from fc2 bias
    for j in range(H):                                # static unroll, H = 15
        z = jnp.full((1, TB), b1_ref[j], jnp.float32)
        for c in range(C):                            # static unroll, C = 2
            z = z + xs[c] * w1_ref[c * H + j]         # VALU mul/add over batch lanes
        y = y + jax.nn.sigmoid(z) * w2_ref[j]         # sigmoid -> EUP slot
    o_ref[...] = y.astype(o_ref.dtype)


def hotcold2_forward(x, w1, b1, w2, b2, *, tb=512):
    """x: (B, C) f32; w1: (C, H); b1: (H,)/(1,H); w2: (H, 1)/(H,); b2: scalar-like.

    Returns (B, 1) f32, equivalent to sigmoid(x @ w1 + b1) @ w2 + b2 (PyTorch HotCold2).
    """
    B, C = x.shape
    H = w1.shape[1]

    # Lane tile: multiple of 128, no bigger than needed for small batches.
    tb = max(128, (int(tb) // 128) * 128)
    tb = min(tb, max(128, pl.cdiv(B, 128) * 128))
    b_pad = pl.cdiv(B, tb) * tb
    grid = (b_pad // tb,)

    # Lane-dense layout: batch on the last (lane) axis; pad batch to the tile grid.
    x_t = jnp.pad(x.astype(jnp.float32), ((0, b_pad - B), (0, 0))).T  # (C, B_pad)

    # Tiny parameters -> flat f32 SMEM operands, resident for the whole grid.
    w1_flat = jnp.asarray(w1, jnp.float32).reshape(C * H)
    b1_flat = jnp.asarray(b1, jnp.float32).reshape(H)
    w2_flat = jnp.asarray(w2, jnp.float32).reshape(H)
    b2_flat = jnp.asarray(b2, jnp.float32).reshape(1)

    smem = pl.BlockSpec(memory_space=pltpu.MemorySpace.SMEM)
    out = pl.pallas_call(
        _hotcold2_kernel,
        out_shape=jax.ShapeDtypeStruct((1, b_pad), jnp.float32),
        grid=grid,
        in_specs=[
            pl.BlockSpec((C, tb), lambda i: (0, i)),       # x tile, batch on lanes
            smem, smem, smem, smem,                        # w1, b1, w2, b2
        ],
        out_specs=pl.BlockSpec((1, tb), lambda i: (0, i)), # lane-dense output
        compiler_params=pltpu.CompilerParams(
            dimension_semantics=("parallel",),             # megacore sharding on v7x
            vmem_limit_bytes=32 * 1024 * 1024,
        ),
    )(x_t, w1_flat, b1_flat, w2_flat, b2_flat)

    return out[0, :B].reshape(B, 1)


def init_params(key, in_channels=2, num_hidden1=15):
    """Deterministic init mirroring torch.nn.Linear's U(-1/sqrt(fan_in), 1/sqrt(fan_in))."""
    k1, k2, k3, k4 = jax.random.split(key, 4)
    lim1 = 1.0 / jnp.sqrt(jnp.float32(in_channels))
    lim2 = 1.0 / jnp.sqrt(jnp.float32(num_hidden1))
    w1 = jax.random.uniform(k1, (in_channels, num_hidden1), jnp.float32, -lim1, lim1)
    b1 = jax.random.uniform(k2, (num_hidden1,), jnp.float32, -lim1, lim1)
    w2 = jax.random.uniform(k3, (num_hidden1, 1), jnp.float32, -lim2, lim2)
    b2 = jax.random.uniform(k4, (1,), jnp.float32, -lim2, lim2)
    return w1, b1, w2, b2


if __name__ == "__main__":
    key = jax.random.PRNGKey(0)
    k_x, k_x2, k_p = jax.random.split(key, 3)

    in_channels, num_hidden1 = 2, 15
    w1, b1, w2, b2 = init_params(k_p, in_channels, num_hidden1)

    def ref_fwd(xx):
        return jax.nn.sigmoid(xx @ w1 + b1) @ w2 + b2

    # Small batch: single grid step, padded to one 128-lane tile.
    x_small = jax.random.normal(k_x, (8, in_channels), jnp.float32)
    out_small = jax.block_until_ready(hotcold2_forward(x_small, w1, b1, w2, b2))
    assert out_small.shape == (8, 1)
    assert jnp.allclose(out_small, ref_fwd(x_small), atol=1e-5, rtol=1e-5)

    # Non-multiple-of-128 batch exercising the pipelined batch grid (tb=128 -> 3 steps).
    x_big = jax.random.normal(k_x2, (300, in_channels), jnp.float32)
    out_big = jax.block_until_ready(hotcold2_forward(x_big, w1, b1, w2, b2, tb=128))
    assert out_big.shape == (300, 1)
    assert jnp.allclose(out_big, ref_fwd(x_big), atol=1e-5, rtol=1e-5)

    print("KERNEL_OK")
</pallas_src>

<mosaic_0001>
module attributes {stable_mosaic.version = 11 : i64} {
  func.func @_hotcold2_kernel(%arg0: i32, %arg1: memref<2x128xf32, #tpu.memory_space<vmem>>, %arg2: memref<30xf32, #tpu.memory_space<smem>>, %arg3: memref<15xf32, #tpu.memory_space<smem>>, %arg4: memref<15xf32, #tpu.memory_space<smem>>, %arg5: memref<1xf32, #tpu.memory_space<smem>>, %arg6: memref<1x128xf32, #tpu.memory_space<vmem>>) attributes {dimension_semantics = [#tpu.dimension_semantics<parallel>], iteration_bounds = array<i64: 1>, scalar_prefetch = 0 : i64, scratch_operands = 0 : i64, tpu.core_type = #tpu.core_type<tc>, window_params = [{transform_indices = @transform_0, window_bounds = array<i64: 2, 128>}, {transform_indices = @transform_1, window_bounds = array<i64: 30>}, {transform_indices = @transform_2, window_bounds = array<i64: 15>}, {transform_indices = @transform_3, window_bounds = array<i64: 15>}, {transform_indices = @transform_4, window_bounds = array<i64: 1>}, {transform_indices = @transform_5, window_bounds = array<i64: 1, 128>}]} {
    %c0 = arith.constant 0 : index
    %c0_0 = arith.constant 0 : index
    %0 = vector.load %arg1[%c0, %c0_0] : memref<2x128xf32, #tpu.memory_space<vmem>>, vector<2x128xf32>
    %1 = vector.extract_strided_slice %0 {offsets = [0, 0], sizes = [1, 128], strides = [1, 1]} : vector<2x128xf32> to vector<1x128xf32>
    %2 = vector.extract_strided_slice %0 {offsets = [1, 0], sizes = [1, 128], strides = [1, 1]} : vector<2x128xf32> to vector<1x128xf32>
    %c0_1 = arith.constant 0 : index
    %3 = memref.load %arg5[%c0_1] : memref<1xf32, #tpu.memory_space<smem>>
    %4 = vector.broadcast %3 : f32 to vector<1x128xf32>
    %c0_2 = arith.constant 0 : index
    %5 = memref.load %arg3[%c0_2] : memref<15xf32, #tpu.memory_space<smem>>
    %6 = vector.broadcast %5 : f32 to vector<1x128xf32>
    %c0_3 = arith.constant 0 : index
    %7 = memref.load %arg2[%c0_3] : memref<30xf32, #tpu.memory_space<smem>>
    %8 = vector.broadcast %7 : f32 to vector<1x128xf32>
    %9 = arith.mulf %1, %8 : vector<1x128xf32>
    %10 = arith.addf %6, %9 : vector<1x128xf32>
    %c15 = arith.constant 15 : index
    %11 = memref.load %arg2[%c15] : memref<30xf32, #tpu.memory_space<smem>>
    %12 = vector.broadcast %11 : f32 to vector<1x128xf32>
    %13 = arith.mulf %2, %12 : vector<1x128xf32>
    %14 = arith.addf %10, %13 : vector<1x128xf32>
    %15 = arith.negf %14 : vector<1x128xf32>
    %16 = math.exp %15 : vector<1x128xf32>
    %cst = arith.constant 1.000000e+00 : f32
    %17 = vector.broadcast %cst : f32 to vector<1x128xf32>
    %18 = arith.addf %17, %16 : vector<1x128xf32>
    %19 = arith.divf %17, %18 : vector<1x128xf32>
    %c0_4 = arith.constant 0 : index
    %20 = memref.load %arg4[%c0_4] : memref<15xf32, #tpu.memory_space<smem>>
    %21 = vector.broadcast %20 : f32 to vector<1x128xf32>
    %22 = arith.mulf %19, %21 : vector<1x128xf32>
    %23 = arith.addf %4, %22 : vector<1x128xf32>
    %c1 = arith.constant 1 : index
    %24 = memref.load %arg3[%c1] : memref<15xf32, #tpu.memory_space<smem>>
    %25 = vector.broadcast %24 : f32 to vector<1x128xf32>
    %c1_5 = arith.constant 1 : index
    %26 = memref.load %arg2[%c1_5] : memref<30xf32, #tpu.memory_space<smem>>
    %27 = vector.broadcast %26 : f32 to vector<1x128xf32>
    %28 = arith.mulf %1, %27 : vector<1x128xf32>
    %29 = arith.addf %25, %28 : vector<1x128xf32>
    %c16 = arith.constant 16 : index
    %30 = memref.load %arg2[%c16] : memref<30xf32, #tpu.memory_space<smem>>
    %31 = vector.broadcast %30 : f32 to vector<1x128xf32>
    %32 = arith.mulf %2, %31 : vector<1x128xf32>
    %33 = arith.addf %29, %32 : vector<1x128xf32>
    %34 = arith.negf %33 : vector<1x128xf32>
    %35 = math.exp %34 : vector<1x128xf32>
    %cst_6 = arith.constant 1.000000e+00 : f32
    %36 = vector.broadcast %cst_6 : f32 to vector<1x128xf32>
    %37 = arith.addf %36, %35 : vector<1x128xf32>
    %38 = arith.divf %36, %37 : vector<1x128xf32>
    %c1_7 = arith.constant 1 : index
    %39 = memref.load %arg4[%c1_7] : memref<15xf32, #tpu.memory_space<smem>>
    %40 = vector.broadcast %39 : f32 to vector<1x128xf32>
    %41 = arith.mulf %38, %40 : vector<1x128xf32>
    %42 = arith.addf %23, %41 : vector<1x128xf32>
    %c2 = arith.constant 2 : index
    %43 = memref.load %arg3[%c2] : memref<15xf32, #tpu.memory_space<smem>>
    %44 = vector.broadcast %43 : f32 to vector<1x128xf32>
    %c2_8 = arith.constant 2 : index
    %45 = memref.load %arg2[%c2_8] : memref<30xf32, #tpu.memory_space<smem>>
    %46 = vector.broadcast %45 : f32 to vector<1x128xf32>
    %47 = arith.mulf %1, %46 : vector<1x128xf32>
    %48 = arith.addf %44, %47 : vector<1x128xf32>
    %c17 = arith.constant 17 : index
    %49 = memref.load %arg2[%c17] : memref<30xf32, #tpu.memory_space<smem>>
    %50 = vector.broadcast %49 : f32 to vector<1x128xf32>
    %51 = arith.mulf %2, %50 : vector<1x128xf32>
    %52 = arith.addf %48, %51 : vector<1x128xf32>
    %53 = arith.negf %52 : vector<1x128xf32>
    %54 = math.exp %53 : vector<1x128xf32>
    %cst_9 = arith.constant 1.000000e+00 : f32
    %55 = vector.broadcast %cst_9 : f32 to vector<1x128xf32>
    %56 = arith.addf %55, %54 : vector<1x128xf32>
    %57 = arith.divf %55, %56 : vector<1x128xf32>
    %c2_10 = arith.constant 2 : index
    %58 = memref.load %arg4[%c2_10] : memref<15xf32, #tpu.memory_space<smem>>
    %59 = vector.broadcast %58 : f32 to vector<1x128xf32>
    %60 = arith.mulf %57, %59 : vector<1x128xf32>
    %61 = arith.addf %42, %60 : vector<1x128xf32>
    %c3 = arith.constant 3 : index
    %62 = memref.load %arg3[%c3] : memref<15xf32, #tpu.memory_space<smem>>
    %63 = vector.broadcast %62 : f32 to vector<1x128xf32>
    %c3_11 = arith.constant 3 : index
    %64 = memref.load %arg2[%c3_11] : memref<30xf32, #tpu.memory_space<smem>>
    %65 = vector.broadcast %64 : f32 to vector<1x128xf32>
    %66 = arith.mulf %1, %65 : vector<1x128xf32>
    %67 = arith.addf %63, %66 : vector<1x128xf32>
    %c18 = arith.constant 18 : index
    %68 = memref.load %arg2[%c18] : memref<30xf32, #tpu.memory_space<smem>>
    %69 = vector.broadcast %68 : f32 to vector<1x128xf32>
    %70 = arith.mulf %2, %69 : vector<1x128xf32>
    %71 = arith.addf %67, %70 : vector<1x128xf32>
    %72 = arith.negf %71 : vector<1x128xf32>
    %73 = math.exp %72 : vector<1x128xf32>
    %cst_12 = arith.constant 1.000000e+00 : f32
    %74 = vector.broadcast %cst_12 : f32 to vector<1x128xf32>
    %75 = arith.addf %74, %73 : vector<1x128xf32>
    %76 = arith.divf %74, %75 : vector<1x128xf32>
    %c3_13 = arith.constant 3 : index
    %77 = memref.load %arg4[%c3_13] : memref<15xf32, #tpu.memory_space<smem>>
    %78 = vector.broadcast %77 : f32 to vector<1x128xf32>
    %79 = arith.mulf %76, %78 : vector<1x128xf32>
    %80 = arith.addf %61, %79 : vector<1x128xf32>
    %c4 = arith.constant 4 : index
    %81 = memref.load %arg3[%c4] : memref<15xf32, #tpu.memory_space<smem>>
    %82 = vector.broadcast %81 : f32 to vector<1x128xf32>
    %c4_14 = arith.constant 4 : index
    %83 = memref.load %arg2[%c4_14] : memref<30xf32, #tpu.memory_space<smem>>
    %84 = vector.broadcast %83 : f32 to vector<1x128xf32>
    %85 = arith.mulf %1, %84 : vector<1x128xf32>
    %86 = arith.addf %82, %85 : vector<1x128xf32>
    %c19 = arith.constant 19 : index
    %87 = memref.load %arg2[%c19] : memref<30xf32, #tpu.memory_space<smem>>
    %88 = vector.broadcast %87 : f32 to vector<1x128xf32>
    %89 = arith.mulf %2, %88 : vector<1x128xf32>
    %90 = arith.addf %86, %89 : vector<1x128xf32>
    %91 = arith.negf %90 : vector<1x128xf32>
    %92 = math.exp %91 : vector<1x128xf32>
    %cst_15 = arith.constant 1.000000e+00 : f32
    %93 = vector.broadcast %cst_15 : f32 to vector<1x128xf32>
    %94 = arith.addf %93, %92 : vector<1x128xf32>
    %95 = arith.divf %93, %94 : vector<1x128xf32>
    %c4_16 = arith.constant 4 : index
    %96 = memref.load %arg4[%c4_16] : memref<15xf32, #tpu.memory_space<smem>>
    %97 = vector.broadcast %96 : f32 to vector<1x128xf32>
    %98 = arith.mulf %95, %97 : vector<1x128xf32>
    %99 = arith.addf %80, %98 : vector<1x128xf32>
    %c5 = arith.constant 5 : index
    %100 = memref.load %arg3[%c5] : memref<15xf32, #tpu.memory_space<smem>>
    %101 = vector.broadcast %100 : f32 to vector<1x128xf32>
    %c5_17 = arith.constant 5 : index
    %102 = memref.load %arg2[%c5_17] : memref<30xf32, #tpu.memory_space<smem>>
    %103 = vector.broadcast %102 : f32 to vector<1x128xf32>
    %104 = arith.mulf %1, %103 : vector<1x128xf32>
    %105 = arith.addf %101, %104 : vector<1x128xf32>
    %c20 = arith.constant 20 : index
    %106 = memref.load %arg2[%c20] : memref<30xf32, #tpu.memory_space<smem>>
    %107 = vector.broadcast %106 : f32 to vector<1x128xf32>
    %108 = arith.mulf %2, %107 : vector<1x128xf32>
    %109 = arith.addf %105, %108 : vector<1x128xf32>
    %110 = arith.negf %109 : vector<1x128xf32>
    %111 = math.exp %110 : vector<1x128xf32>
    %cst_18 = arith.constant 1.000000e+00 : f32
    %112 = vector.broadcast %cst_18 : f32 to vector<1x128xf32>
    %113 = arith.addf %112, %111 : vector<1x128xf32>
    %114 = arith.divf %112, %113 : vector<1x128xf32>
    %c5_19 = arith.constant 5 : index
    %115 = memref.load %arg4[%c5_19] : memref<15xf32, #tpu.memory_space<smem>>
    %116 = vector.broadcast %115 : f32 to vector<1x128xf32>
    %117 = arith.mulf %114, %116 : vector<1x128xf32>
    %118 = arith.addf %99, %117 : vector<1x128xf32>
    %c6 = arith.constant 6 : index
    %119 = memref.load %arg3[%c6] : memref<15xf32, #tpu.memory_space<smem>>
    %120 = vector.broadcast %119 : f32 to vector<1x128xf32>
    %c6_20 = arith.constant 6 : index
    %121 = memref.load %arg2[%c6_20] : memref<30xf32, #tpu.memory_space<smem>>
    %122 = vector.broadcast %121 : f32 to vector<1x128xf32>
    %123 = arith.mulf %1, %122 : vector<1x128xf32>
    %124 = arith.addf %120, %123 : vector<1x128xf32>
    %c21 = arith.constant 21 : index
    %125 = memref.load %arg2[%c21] : memref<30xf32, #tpu.memory_space<smem>>
    %126 = vector.broadcast %125 : f32 to vector<1x128xf32>
    %127 = arith.mulf %2, %126 : vector<1x128xf32>
    %128 = arith.addf %124, %127 : vector<1x128xf32>
    %129 = arith.negf %128 : vector<1x128xf32>
    %130 = math.exp %129 : vector<1x128xf32>
    %cst_21 = arith.constant 1.000000e+00 : f32
    %131 = vector.broadcast %cst_21 : f32 to vector<1x128xf32>
    %132 = arith.addf %131, %130 : vector<1x128xf32>
    %133 = arith.divf %131, %132 : vector<1x128xf32>
    %c6_22 = arith.constant 6 : index
    %134 = memref.load %arg4[%c6_22] : memref<15xf32, #tpu.memory_space<smem>>
    %135 = vector.broadcast %134 : f32 to vector<1x128xf32>
    %136 = arith.mulf %133, %135 : vector<1x128xf32>
    %137 = arith.addf %118, %136 : vector<1x128xf32>
    %c7 = arith.constant 7 : index
    %138 = memref.load %arg3[%c7] : memref<15xf32, #tpu.memory_space<smem>>
    %139 = vector.broadcast %138 : f32 to vector<1x128xf32>
    %c7_23 = arith.constant 7 : index
    %140 = memref.load %arg2[%c7_23] : memref<30xf32, #tpu.memory_space<smem>>
    %141 = vector.broadcast %140 : f32 to vector<1x128xf32>
    %142 = arith.mulf %1, %141 : vector<1x128xf32>
    %143 = arith.addf %139, %142 : vector<1x128xf32>
    %c22 = arith.constant 22 : index
    %144 = memref.load %arg2[%c22] : memref<30xf32, #tpu.memory_space<smem>>
    %145 = vector.broadcast %144 : f32 to vector<1x128xf32>
    %146 = arith.mulf %2, %145 : vector<1x128xf32>
    %147 = arith.addf %143, %146 : vector<1x128xf32>
    %148 = arith.negf %147 : vector<1x128xf32>
    %149 = math.exp %148 : vector<1x128xf32>
    %cst_24 = arith.constant 1.000000e+00 : f32
    %150 = vector.broadcast %cst_24 : f32 to vector<1x128xf32>
    %151 = arith.addf %150, %149 : vector<1x128xf32>
    %152 = arith.divf %150, %151 : vector<1x128xf32>
    %c7_25 = arith.constant 7 : index
    %153 = memref.load %arg4[%c7_25] : memref<15xf32, #tpu.memory_space<smem>>
    %154 = vector.broadcast %153 : f32 to vector<1x128xf32>
    %155 = arith.mulf %152, %154 : vector<1x128xf32>
    %156 = arith.addf %137, %155 : vector<1x128xf32>
    %c8 = arith.constant 8 : index
    %157 = memref.load %arg3[%c8] : memref<15xf32, #tpu.memory_space<smem>>
    %158 = vector.broadcast %157 : f32 to vector<1x128xf32>
    %c8_26 = arith.constant 8 : index
    %159 = memref.load %arg2[%c8_26] : memref<30xf32, #tpu.memory_space<smem>>
    %160 = vector.broadcast %159 : f32 to vector<1x128xf32>
    %161 = arith.mulf %1, %160 : vector<1x128xf32>
    %162 = arith.addf %158, %161 : vector<1x128xf32>
    %c23 = arith.constant 23 : index
    %163 = memref.load %arg2[%c23] : memref<30xf32, #tpu.memory_space<smem>>
    %164 = vector.broadcast %163 : f32 to vector<1x128xf32>
    %165 = arith.mulf %2, %164 : vector<1x128xf32>
    %166 = arith.addf %162, %165 : vector<1x128xf32>
    %167 = arith.negf %166 : vector<1x128xf32>
    %168 = math.exp %167 : vector<1x128xf32>
    %cst_27 = arith.constant 1.000000e+00 : f32
    %169 = vector.broadcast %cst_27 : f32 to vector<1x128xf32>
    %170 = arith.addf %169, %168 : vector<1x128xf32>
    %171 = arith.divf %169, %170 : vector<1x128xf32>
    %c8_28 = arith.constant 8 : index
    %172 = memref.load %arg4[%c8_28] : memref<15xf32, #tpu.memory_space<smem>>
    %173 = vector.broadcast %172 : f32 to vector<1x128xf32>
    %174 = arith.mulf %171, %173 : vector<1x128xf32>
    %175 = arith.addf %156, %174 : vector<1x128xf32>
    %c9 = arith.constant 9 : index
    %176 = memref.load %arg3[%c9] : memref<15xf32, #tpu.memory_space<smem>>
    %177 = vector.broadcast %176 : f32 to vector<1x128xf32>
    %c9_29 = arith.constant 9 : index
    %178 = memref.load %arg2[%c9_29] : memref<30xf32, #tpu.memory_space<smem>>
    %179 = vector.broadcast %178 : f32 to vector<1x128xf32>
    %180 = arith.mulf %1, %179 : vector<1x128xf32>
    %181 = arith.addf %177, %180 : vector<1x128xf32>
    %c24 = arith.constant 24 : index
    %182 = memref.load %arg2[%c24] : memref<30xf32, #tpu.memory_space<smem>>
    %183 = vector.broadcast %182 : f32 to vector<1x128xf32>
    %184 = arith.mulf %2, %183 : vector<1x128xf32>
    %185 = arith.addf %181, %184 : vector<1x128xf32>
    %186 = arith.negf %185 : vector<1x128xf32>
    %187 = math.exp %186 : vector<1x128xf32>
    %cst_30 = arith.constant 1.000000e+00 : f32
    %188 = vector.broadcast %cst_30 : f32 to vector<1x128xf32>
    %189 = arith.addf %188, %187 : vector<1x128xf32>
    %190 = arith.divf %188, %189 : vector<1x128xf32>
    %c9_31 = arith.constant 9 : index
    %191 = memref.load %arg4[%c9_31] : memref<15xf32, #tpu.memory_space<smem>>
    %192 = vector.broadcast %191 : f32 to vector<1x128xf32>
    %193 = arith.mulf %190, %192 : vector<1x128xf32>
    %194 = arith.addf %175, %193 : vector<1x128xf32>
    %c10 = arith.constant 10 : index
    %195 = memref.load %arg3[%c10] : memref<15xf32, #tpu.memory_space<smem>>
    %196 = vector.broadcast %195 : f32 to vector<1x128xf32>
    %c10_32 = arith.constant 10 : index
    %197 = memref.load %arg2[%c10_32] : memref<30xf32, #tpu.memory_space<smem>>
    %198 = vector.broadcast %197 : f32 to vector<1x128xf32>
    %199 = arith.mulf %1, %198 : vector<1x128xf32>
    %200 = arith.addf %196, %199 : vector<1x128xf32>
    %c25 = arith.constant 25 : index
    %201 = memref.load %arg2[%c25] : memref<30xf32, #tpu.memory_space<smem>>
    %202 = vector.broadcast %201 : f32 to vector<1x128xf32>
    %203 = arith.mulf %2, %202 : vector<1x128xf32>
    %204 = arith.addf %200, %203 : vector<1x128xf32>
    %205 = arith.negf %204 : vector<1x128xf32>
    %206 = math.exp %205 : vector<1x128xf32>
    %cst_33 = arith.constant 1.000000e+00 : f32
    %207 = vector.broadcast %cst_33 : f32 to vector<1x128xf32>
    %208 = arith.addf %207, %206 : vector<1x128xf32>
    %209 = arith.divf %207, %208 : vector<1x128xf32>
    %c10_34 = arith.constant 10 : index
    %210 = memref.load %arg4[%c10_34] : memref<15xf32, #tpu.memory_space<smem>>
    %211 = vector.broadcast %210 : f32 to vector<1x128xf32>
    %212 = arith.mulf %209, %211 : vector<1x128xf32>
    %213 = arith.addf %194, %212 : vector<1x128xf32>
    %c11 = arith.constant 11 : index
    %214 = memref.load %arg3[%c11] : memref<15xf32, #tpu.memory_space<smem>>
    %215 = vector.broadcast %214 : f32 to vector<1x128xf32>
    %c11_35 = arith.constant 11 : index
    %216 = memref.load %arg2[%c11_35] : memref<30xf32, #tpu.memory_space<smem>>
    %217 = vector.broadcast %216 : f32 to vector<1x128xf32>
    %218 = arith.mulf %1, %217 : vector<1x128xf32>
    %219 = arith.addf %215, %218 : vector<1x128xf32>
    %c26 = arith.constant 26 : index
    %220 = memref.load %arg2[%c26] : memref<30xf32, #tpu.memory_space<smem>>
    %221 = vector.broadcast %220 : f32 to vector<1x128xf32>
    %222 = arith.mulf %2, %221 : vector<1x128xf32>
    %223 = arith.addf %219, %222 : vector<1x128xf32>
    %224 = arith.negf %223 : vector<1x128xf32>
    %225 = math.exp %224 : vector<1x128xf32>
    %cst_36 = arith.constant 1.000000e+00 : f32
    %226 = vector.broadcast %cst_36 : f32 to vector<1x128xf32>
    %227 = arith.addf %226, %225 : vector<1x128xf32>
    %228 = arith.divf %226, %227 : vector<1x128xf32>
    %c11_37 = arith.constant 11 : index
    %229 = memref.load %arg4[%c11_37] : memref<15xf32, #tpu.memory_space<smem>>
    %230 = vector.broadcast %229 : f32 to vector<1x128xf32>
    %231 = arith.mulf %228, %230 : vector<1x128xf32>
    %232 = arith.addf %213, %231 : vector<1x128xf32>
    %c12 = arith.constant 12 : index
    %233 = memref.load %arg3[%c12] : memref<15xf32, #tpu.memory_space<smem>>
    %234 = vector.broadcast %233 : f32 to vector<1x128xf32>
    %c12_38 = arith.constant 12 : index
    %235 = memref.load %arg2[%c12_38] : memref<30xf32, #tpu.memory_space<smem>>
    %236 = vector.broadcast %235 : f32 to vector<1x128xf32>
    %237 = arith.mulf %1, %236 : vector<1x128xf32>
    %238 = arith.addf %234, %237 : vector<1x128xf32>
    %c27 = arith.constant 27 : index
    %239 = memref.load %arg2[%c27] : memref<30xf32, #tpu.memory_space<smem>>
    %240 = vector.broadcast %239 : f32 to vector<1x128xf32>
    %241 = arith.mulf %2, %240 : vector<1x128xf32>
    %242 = arith.addf %238, %241 : vector<1x128xf32>
    %243 = arith.negf %242 : vector<1x128xf32>
    %244 = math.exp %243 : vector<1x128xf32>
    %cst_39 = arith.constant 1.000000e+00 : f32
    %245 = vector.broadcast %cst_39 : f32 to vector<1x128xf32>
    %246 = arith.addf %245, %244 : vector<1x128xf32>
    %247 = arith.divf %245, %246 : vector<1x128xf32>
    %c12_40 = arith.constant 12 : index
    %248 = memref.load %arg4[%c12_40] : memref<15xf32, #tpu.memory_space<smem>>
    %249 = vector.broadcast %248 : f32 to vector<1x128xf32>
    %250 = arith.mulf %247, %249 : vector<1x128xf32>
    %251 = arith.addf %232, %250 : vector<1x128xf32>
    %c13 = arith.constant 13 : index
    %252 = memref.load %arg3[%c13] : memref<15xf32, #tpu.memory_space<smem>>
    %253 = vector.broadcast %252 : f32 to vector<1x128xf32>
    %c13_41 = arith.constant 13 : index
    %254 = memref.load %arg2[%c13_41] : memref<30xf32, #tpu.memory_space<smem>>
    %255 = vector.broadcast %254 : f32 to vector<1x128xf32>
    %256 = arith.mulf %1, %255 : vector<1x128xf32>
    %257 = arith.addf %253, %256 : vector<1x128xf32>
    %c28 = arith.constant 28 : index
    %258 = memref.load %arg2[%c28] : memref<30xf32, #tpu.memory_space<smem>>
    %259 = vector.broadcast %258 : f32 to vector<1x128xf32>
    %260 = arith.mulf %2, %259 : vector<1x128xf32>
    %261 = arith.addf %257, %260 : vector<1x128xf32>
    %262 = arith.negf %261 : vector<1x128xf32>
    %263 = math.exp %262 : vector<1x128xf32>
    %cst_42 = arith.constant 1.000000e+00 : f32
    %264 = vector.broadcast %cst_42 : f32 to vector<1x128xf32>
    %265 = arith.addf %264, %263 : vector<1x128xf32>
    %266 = arith.divf %264, %265 : vector<1x128xf32>
    %c13_43 = arith.constant 13 : index
    %267 = memref.load %arg4[%c13_43] : memref<15xf32, #tpu.memory_space<smem>>
    %268 = vector.broadcast %267 : f32 to vector<1x128xf32>
    %269 = arith.mulf %266, %268 : vector<1x128xf32>
    %270 = arith.addf %251, %269 : vector<1x128xf32>
    %c14 = arith.constant 14 : index
    %271 = memref.load %arg3[%c14] : memref<15xf32, #tpu.memory_space<smem>>
    %272 = vector.broadcast %271 : f32 to vector<1x128xf32>
    %c14_44 = arith.constant 14 : index
    %273 = memref.load %arg2[%c14_44] : memref<30xf32, #tpu.memory_space<smem>>
    %274 = vector.broadcast %273 : f32 to vector<1x128xf32>
    %275 = arith.mulf %1, %274 : vector<1x128xf32>
    %276 = arith.addf %272, %275 : vector<1x128xf32>
    %c29 = arith.constant 29 : index
    %277 = memref.load %arg2[%c29] : memref<30xf32, #tpu.memory_space<smem>>
    %278 = vector.broadcast %277 : f32 to vector<1x128xf32>
    %279 = arith.mulf %2, %278 : vector<1x128xf32>
    %280 = arith.addf %276, %279 : vector<1x128xf32>
    %281 = arith.negf %280 : vector<1x128xf32>
    %282 = math.exp %281 : vector<1x128xf32>
    %cst_45 = arith.constant 1.000000e+00 : f32
    %283 = vector.broadcast %cst_45 : f32 to vector<1x128xf32>
    %284 = arith.addf %283, %282 : vector<1x128xf32>
    %285 = arith.divf %283, %284 : vector<1x128xf32>
    %c14_46 = arith.constant 14 : index
    %286 = memref.load %arg4[%c14_46] : memref<15xf32, #tpu.memory_space<smem>>
    %287 = vector.broadcast %286 : f32 to vector<1x128xf32>
    %288 = arith.mulf %285, %287 : vector<1x128xf32>
    %289 = arith.addf %270, %288 : vector<1x128xf32>
    %c0_47 = arith.constant 0 : index
    %c0_48 = arith.constant 0 : index
    %290 = vector.load %arg6[%c0_47, %c0_48] : memref<1x128xf32, #tpu.memory_space<vmem>>, vector<1x128xf32>
    tpu.vector_store %arg6[%c0_47, %c0_48], %289 {strides = array<i32>} : memref<1x128xf32, #tpu.memory_space<vmem>>, vector<1x128xf32>,
    return
  }
  func.func @transform_0(%arg0: i32) -> (i32, i32) {
    %c0_i32 = arith.constant 0 : i32
    %c0_i32_0 = arith.constant 0 : i32
    return %c0_i32, %arg0 : i32, i32
  }
  func.func @transform_1(%arg0: i32) -> i32 {
    %c0_i32 = arith.constant 0 : i32
    %c0_i32_0 = arith.constant 0 : i32
    return %c0_i32 : i32
  }
  func.func @transform_2(%arg0: i32) -> i32 {
    %c0_i32 = arith.constant 0 : i32
    %c0_i32_0 = arith.constant 0 : i32
    return %c0_i32 : i32
  }
  func.func @transform_3(%arg0: i32) -> i32 {
    %c0_i32 = arith.constant 0 : i32
    %c0_i32_0 = arith.constant 0 : i32
    return %c0_i32 : i32
  }
  func.func @transform_4(%arg0: i32) -> i32 {
    %c0_i32 = arith.constant 0 : i32
    %c0_i32_0 = arith.constant 0 : i32
    return %c0_i32 : i32
  }
  func.func @transform_5(%arg0: i32) -> (i32, i32) {
    %c0_i32 = arith.constant 0 : i32
    %c0_i32_0 = arith.constant 0 : i32
    return %c0_i32, %arg0 : i32, i32
  }
}

</mosaic_0001>

<bundles_post_ra>
// kernel: tpu_custom_call.1
= control target key start
LH: loop header
LB: loop body
LE: loop exit
PB: predicated region body
PF: predicated region fallthrough
CT: control target
= control target key end

     0   :  { %11 = vsyncpa [#allocation5], 0  ;;  %s792_s0 = inlined_call_operand.vmem [shape: f32[2,128], index: 0, kind: input, shape index: {}]   ;;  %s793_s1 = inlined_call_operand.vmem [shape: f32[30], index: 1, kind: input, shape index: {}]   ;;  %s794_s2 = inlined_call_operand.vmem [shape: f32[15], index: 2, kind: input, shape index: {}]   ;;  %s795_s3 = inlined_call_operand.vmem [shape: f32[15], index: 3, kind: input, shape index: {}]   ;;  %s796_s4 = inlined_call_operand.<no memory space> [shape: f32[1], index: 4, kind: input, shape index: {}]   ;;  %s797_s5 = inlined_call_operand.hbm [shape: f32[1,128], index: 5, kind: output, shape index: {}]  }
   0x1   :  { %12 = vsyncpa [#allocation7], 0  ;;  %s32_s20 = sshll.u32 %s794_s2, 4  ;;  %s33_s20 = int_to_ptr.vmem [resolvable:$true] %s32_s20 }
   0x2   :  { %13 = vsyncpa [#allocation4], 0  ;;  %s22_s23 = sshll.u32 %s793_s1, 4  ;;  %s559_s24 = scalar_lea.vmem %s33_s20, 16  ;;  %s23_s23 = int_to_ptr.vmem [resolvable:$true] %s22_s23 }
   0x3   :  { %p560_p0 = scmp.ne.s32.totalorder %s33_s20, %s559_s24  ;;  %p564_p1 = scmp.lt.s32.totalorder %s33_s20, %s33_s20 }
   0x4   :  { %p565_p2 = scmp.lt.s32.totalorder %s559_s24, %s559_s24 }
   0x6   :  { %p566_p3 = por %p565_p2, %p564_p1 }
   0x8   :  { %p567_p4 = pnand %p566_p3, %p560_p0 }
   0xa   :  { %570 = shalt.err (!%p567_p4)
}
   0xb   :  { %s621_s25 = smov [#allocation6]   ;;  %s571_s26 = scalar_lea.vmem %s23_s23, 16 }
   0xc   :  { %35 = dma.vmem_to_smem %s33_s20, 16, %s621_s25, [#allocation7]  }
   0xd   :  { %p572_p5 = scmp.ne.s32.totalorder %s23_s23, %s571_s26  ;;  %p576_p6 = scmp.lt.s32.totalorder %s23_s23, %s23_s23 }
   0xe   :  { %p577_p7 = scmp.lt.s32.totalorder %s571_s26, %s571_s26 }
  0x10   :  { %p578_p8 = por %p577_p7, %p576_p6 }
  0x12   :  { %p579_p9 = pnand %p578_p8, %p572_p5 }
  0x14   :  { %582 = shalt.err (!%p579_p9)
}
  0x15   :  { %s622_s2 = smov [#allocation3]   ;;  %s42_s28 = sshll.u32 %s795_s3, 4  ;;  %s43_s28 = int_to_ptr.vmem [resolvable:$true] %s42_s28 }
  0x16   :  { %25 = dma.vmem_to_smem %s23_s23, 16, %s622_s2, [#allocation5]  }
  0x17   :  { %s583_s29 = scalar_lea.vmem %s43_s28, 16  ;;  %p588_p11 = scmp.lt.s32.totalorder %s43_s28, %s43_s28 }
  0x18   :  { %p584_p10 = scmp.ne.s32.totalorder %s43_s28, %s583_s29  ;;  %p589_p12 = scmp.lt.s32.totalorder %s583_s29, %s583_s29 }
  0x1a   :  { %p590_p13 = por %p589_p12, %p588_p11 }
  0x1c   :  { %p591_p0 = pnand %p590_p13, %p584_p10 }
  0x1e   :  { %594 = shalt.err (!%p591_p0)
}
  0x1f   :  { %s623_s30 = smov [#allocation8]  }
  0x20   :  { %45 = dma.vmem_to_smem %s43_s28, 16, %s623_s30, [#allocation7]  }
  0x21   :  { %615 = dma.done.wait [#allocation5], 16  }
  0x22   :  { %616 = vsyncadd [#allocation5], 4294967280 }
  0x23   :  { %617 = dma.done.wait [#allocation7], 32  }
  0x24   :  { %618 = vsyncadd [#allocation7], 4294967264 }
  0x25   :  { %57 = sfence }
  0x26   :  { %s61_s6 = sld [smem:[#allocation6]]  ;;  %v667_v0 = vld [vmem:[%s792_s0] sm:$0x3] }
  0x27   :  { %s63_s7 = sld [smem:[#allocation3]] }
  0x28   :  { %s423_s8 = sld [smem:[#allocation3 + $0xf]] }
  0x29   :  { %s425_s9 = sld [smem:[#allocation6 + $0x1]] }
  0x2a   :  { %s426_s11 = sld [smem:[#allocation3 + $0x1]] }
  0x2b   :  { %s427_s12 = sld [smem:[#allocation3 + $0x10]] }
  0x2c   :  { %v62_v1 = vstv %s61_s6  ;;  %s430_s13 = sld [smem:[#allocation6 + $0x2]] }
  0x2d   :  { %v64_v2 = vstv %s63_s7  ;;  %s431_s14 = sld [smem:[#allocation3 + $0x2]] }
  0x2e   :  { %v65_v3 = vmul.f32 %v64_v2, %v667_v0  ;;  %v68_v4 = vstv %s423_s8  ;;  %s432_s15 = sld [smem:[#allocation3 + $0x11]] }
  0x2f   :  { %v69_v5 = vmul.f32 %v68_v4, %v667_v0  ;;  %v85_v8 = vstv %s425_s9  ;;  %s435_s0 = sld [smem:[#allocation6 + $0x3]] }
  0x30   :  { %v66_v6 = vadd.f32 %v65_v3, %v62_v1  ;;  %v87_v9 = vstv %s426_s11  ;;  %s436_s16 = sld [smem:[#allocation3 + $0x3]] }
  0x31   :  { %v71_v7 = vrot.slane %v69_v5, 1  ;;  %v88_v10 = vmul.f32 %v87_v9, %v667_v0  ;;  %v91_v11 = vstv %s427_s12  ;;  %s437_s17 = sld [smem:[#allocation3 + $0x12]] }
  0x32   :  { %v92_v13 = vmul.f32 %v91_v11, %v667_v0  ;;  %v108_v17 = vstv %s430_s13  ;;  %s674_s18 = sld [smem:[#allocation6 + $0x4]] }
  0x33   :  { %v73_v12 = vadd.f32 %v71_v7, %v66_v6  ;;  %v89_v14 = vadd.f32 %v88_v10, %v85_v8  ;;  %v110_v18 = vstv %s431_s14  ;;  %s441_s19 = sld [smem:[#allocation3 + $0x4]] }
  0x34   :  { %v94_v16 = vrot.slane %v92_v13, 1  ;;  %v111_v19 = vmul.f32 %v110_v18, %v667_v0  ;;  %v114_v20 = vstv %s432_s15  ;;  %s442_s20 = sld [smem:[#allocation3 + $0x13]] }
  0x35   :  { %v424_v15 = vmul.f32 -1.442695, %v73_v12  ;;  %v115_v22 = vmul.f32 %v114_v20, %v667_v0  ;;  %v131_v26 = vstv %s435_s0  ;;  %s678_s21 = sld [smem:[#allocation6 + $0x5]] }
  0x36   :  { %v96_v21 = vadd.f32 %v94_v16, %v89_v14  ;;  %v112_v23 = vadd.f32 %v111_v19, %v108_v17  ;;  %v133_v27 = vstv %s436_s16  ;;  %s446_s22 = sld [smem:[#allocation3 + $0x5]] }
  0x37   :  { %499 = vpow2.f32 %v424_v15  ;;  %v117_v25 = vrot.slane %v115_v22, 1  ;;  %v134_v28 = vmul.f32 %v133_v27, %v667_v0  ;;  %v137_v29 = vstv %s437_s17  ;;  %s447_s23 = sld [smem:[#allocation3 + $0x14]] }
  0x38   :  { %v428_v24 = vmul.f32 -1.442695, %v96_v21  ;;  %v138_v31 = vmul.f32 %v137_v29, %v667_v0  ;;  %v154_v35 = vstv %s674_s18  ;;  %s683_s24 = sld [smem:[#allocation6 + $0x6]] }
  0x39   :  { %v119_v30 = vadd.f32 %v117_v25, %v112_v23  ;;  %v135_v32 = vadd.f32 %v134_v28, %v131_v26  ;;  %v156_v36 = vstv %s441_s19  ;;  %s451_s25 = sld [smem:[#allocation3 + $0x6]] }
  0x3a   :  { %501 = vpow2.f32 %v428_v24  ;;  %v140_v34 = vrot.slane %v138_v31, 1  ;;  %v157_v37 = vmul.f32 %v156_v36, %v667_v0  ;;  %v160_v38 = vstv %s442_s20  ;;  %s452_s26 = sld [smem:[#allocation3 + $0x15]] }
  0x3b   :  { %v433_v33 = vmul.f32 -1.442695, %v119_v30  ;;  %v161_v40 = vmul.f32 %v160_v38, %v667_v0  ;;  %v177_v44 = vstv %s678_s21  ;;  %s688_s2 = sld [smem:[#allocation6 + $0x7]] }
  0x3c   :  { %v142_v39 = vadd.f32 %v140_v34, %v135_v32  ;;  %v158_v41 = vadd.f32 %v157_v37, %v154_v35  ;;  %v179_v45 = vstv %s446_s22  ;;  %s456_s1 = sld [smem:[#allocation3 + $0x7]] }
  0x3d   :  { %503 = vpow2.f32 %v433_v33  ;;  %v163_v43 = vrot.slane %v161_v40, 1  ;;  %v180_v46 = vmul.f32 %v179_v45, %v667_v0  ;;  %v183_v47 = vstv %s447_s23  ;;  %s457_s27 = sld [smem:[#allocation3 + $0x16]] }
  0x3e   :  { %v438_v42 = vmul.f32 -1.442695, %v142_v39  ;;  %v184_v49 = vmul.f32 %v183_v47, %v667_v0  ;;  %v200_v52 = vstv %s683_s24  ;;  %s693_s28 = sld [smem:[#allocation6 + $0x8]]  ;;  %v60_v33 = vstv %s796_s4 }
  0x3f   :  { %v165_v48 = vadd.f32 %v163_v43, %v158_v41  ;;  %v181_v51 = vadd.f32 %v180_v46, %v177_v44  ;;  %v202_v56 = vstv %s451_s25  ;;  %s461_s29 = sld [smem:[#allocation3 + $0x8]] }
  0x40   :  { %505 = vpow2.f32 %v438_v42  ;;  %v186_v55 = vrot.slane %v184_v49, 1  ;;  %v203_v57 = vmul.f32 %v202_v56, %v667_v0  ;;  %v206_v58 = vstv %s452_s26  ;;  %s462_s30 = sld [smem:[#allocation3 + $0x17]] }
  0x41   :  { %v443_v54 = vmul.f32 -1.442695, %v165_v48  ;;  %v207_v60 = vmul.f32 %v206_v58, %v667_v0  ;;  %v223_v63 = vstv %s688_s2  ;;  %s697_s6 = sld [smem:[#allocation8]] }
  0x42   :  { %v188_v59 = vadd.f32 %v186_v55, %v181_v51  ;;  %v204_v62 = vadd.f32 %v203_v57, %v200_v52  ;;  %v225_v4 = vstv %s456_s1  ;;  %s700_s7 = sld [smem:[#allocation6 + $0x9]] }
  0x43   :  { %v209_v3 = vrot.slane %v207_v60, 1  ;;  %v226_v5 = vmul.f32 %v225_v4, %v667_v0  ;;  %v229_v6 = vstv %s457_s27  ;;  %s466_s8 = sld [smem:[#allocation3 + $0x9]] }
  0x44   :  { %v500_v50 = vpop.eup %499  ;;  %v448_v2 = vmul.f32 -1.442695, %v188_v59  ;;  %v230_v8 = vmul.f32 %v229_v6, %v667_v0  ;;  %v246_v11 = vstv %s693_s28  ;;  %s467_s9 = sld [smem:[#allocation3 + $0x18]] }
  0x45   :  { %v77_v53 = vadd.f32 1.0, %v500_v50  ;;  %v211_v7 = vadd.f32 %v209_v3, %v204_v62  ;;  %v227_v10 = vadd.f32 %v226_v5, %v223_v63  ;;  %s704_s3 = sld [smem:[#allocation8 + $0x1]]  ;;  %v248_v15 = vstv %s461_s29 }
  0x46   :  { %v232_v14 = vrot.slane %v230_v8, 1  ;;  %v249_v16 = vmul.f32 %v248_v15, %v667_v0  ;;  %v252_v17 = vstv %s462_s30  ;;  %s707_s10 = sld [smem:[#allocation6 + $0xa]] }
  0x47   :  { %507 = vrcp.f32 %v77_v53  ;;  %v502_v61 = vpop.eup %501  ;;  %v453_v13 = vmul.f32 -1.442695, %v211_v7  ;;  %v253_v19 = vmul.f32 %v252_v17, %v667_v0  ;;  %s710_s11 = sld [smem:[#allocation3 + $0xa]]  ;;  %v81_v27 = vstv %s697_s6 }
  0x48   :  { %509 = vpow2.f32 %v443_v54  ;;  %v100_v1 = vadd.f32 1.0, %v502_v61  ;;  %v234_v18 = vadd.f32 %v232_v14, %v227_v10  ;;  %v250_v21 = vadd.f32 %v249_v16, %v246_v11  ;;  %s713_s12 = sld [smem:[#allocation3 + $0x19]] }
  0x49   :  { %v269_v22 = vstv %s700_s7  ;;  %s715_s13 = sld [smem:[#allocation8 + $0x2]]  ;;  %v255_v25 = vrot.slane %v253_v19, 1  ;;  %v271_v26 = vstv %s466_s8 }
  0x4a   :  { %511 = vrcp.f32 %v100_v1  ;;  %v504_v9 = vpop.eup %503  ;;  %v458_v24 = vmul.f32 -1.442695, %v234_v18  ;;  %v272_v28 = vmul.f32 %v271_v26, %v667_v0  ;;  %v275_v29 = vstv %s467_s9  ;;  %s719_s14 = sld [smem:[#allocation6 + $0xb]] }
  0x4b   :  { %513 = vpow2.f32 %v448_v2  ;;  %v123_v12 = vadd.f32 1.0, %v504_v9  ;;  %v257_v30 = vadd.f32 %v255_v25, %v250_v21  ;;  %v276_v31 = vmul.f32 %v275_v29, %v667_v0  ;;  %s722_s15 = sld [smem:[#allocation3 + $0xb]] }
  0x4c   :  { %v273_v34 = vadd.f32 %v272_v28, %v269_v22  ;;  %v292_v35 = vstv %s707_s10  ;;  %s728_s17 = sld [smem:[#allocation3 + $0x1a]]  ;;  %v104_v41 = vstv %s704_s3  ;;  %s624_s10 = smov [#allocation9]  }
  0x4d   :  { %515 = vrcp.f32 %v123_v12  ;;  %v506_v20 = vpop.eup %505  ;;  %s730_s18 = sld [smem:[#allocation8 + $0x3]]  ;;  %v463_v38 = vmul.f32 -1.442695, %v257_v30  ;;  %v278_v39 = vrot.slane %v276_v31, 1  ;;  %v294_v40 = vstv %s710_s11  ;;  %s413_s11 = sshll.u32 %s624_s10, 4  ;;  %s414_s11 = int_to_ptr.vmem [resolvable:$true] %s413_s11 }
  0x4e   :  { %517 = vpow2.f32 %v453_v13  ;;  %v146_v23 = vadd.f32 1.0, %v506_v20  ;;  %v295_v43 = vmul.f32 %v294_v40, %v667_v0  ;;  %v298_v44 = vstv %s713_s12  ;;  %s736_s19 = sld [smem:[#allocation6 + $0xc]]  ;;  %s595_s12 = scalar_lea.vmem %s414_s11, 16 }
  0x4f   :  { %v280_v45 = vadd.f32 %v278_v39, %v273_v34  ;;  %v299_v46 = vmul.f32 %v298_v44, %v667_v0  ;;  %s739_s4 = sld [smem:[#allocation3 + $0xc]]  ;;  %v127_v56 = vstv %s715_s13  ;;  %p596_p1 = scmp.ne.s32.totalorder %s414_s11, %s595_s12 }
  0x50   :  { %519 = vrcp.f32 %v146_v23  ;;  %v296_v49 = vadd.f32 %v295_v43, %v292_v35  ;;  %v315_v50 = vstv %s719_s14  ;;  %s742_s20 = sld [smem:[#allocation3 + $0x1b]]  ;;  %s599_s13 = scalar_lea.vmem %s414_s11, 32 }
  0x51   :  { %521 = vpow2.f32 %v458_v24  ;;  %s744_s21 = sld [smem:[#allocation8 + $0x4]]  ;;  %v468_v53 = vmul.f32 -1.442695, %v280_v45  ;;  %v301_v54 = vrot.slane %v299_v46, 1  ;;  %v317_v55 = vstv %s722_s15  ;;  %p600_p2 = scmp.lt.s32.totalorder %s414_s11, %s414_s11 }
  0x52   :  { %523 = vpow2.f32 %v463_v38  ;;  %v318_v58 = vmul.f32 %v317_v55, %v667_v0  ;;  %v321_v59 = vstv %s728_s17  ;;  %s750_s22 = sld [smem:[#allocation6 + $0xd]]  ;;  %p601_p3 = scmp.lt.s32.totalorder %s599_s13, %s595_s12 }
  0x53   :  { %v303_v60 = vadd.f32 %v301_v54, %v296_v49  ;;  %v322_v61 = vmul.f32 %v321_v59, %v667_v0  ;;  %s753_s23 = sld [smem:[#allocation3 + $0xd]]  ;;  %v150_v8 = vstv %s730_s18 }
  0x54   :  { %v508_v32 = vpop.eup %507  ;;  %v319_v1 = vadd.f32 %v318_v58, %v315_v50  ;;  %v338_v2 = vstv %s736_s19  ;;  %s756_s24 = sld [smem:[#allocation3 + $0x1c]]  ;;  %p602_p4 = por %p601_p3, %p600_p2 }
  0x55   :  { %v510_v36 = vpop.eup %509  ;;  %v82_v37 = vmul.f32 %v508_v32, %v81_v27  ;;  %s758_s25 = sld [smem:[#allocation8 + $0x5]]  ;;  %v473_v5 = vmul.f32 -1.442695, %v303_v60  ;;  %v324_v6 = vrot.slane %v322_v61, 1  ;;  %v340_v7 = vstv %s739_s4 }
  0x56   :  { %v169_v42 = vadd.f32 1.0, %v510_v36  ;;  %v341_v10 = vmul.f32 %v340_v7, %v667_v0  ;;  %v344_v11 = vstv %s742_s20  ;;  %s764_s26 = sld [smem:[#allocation6 + $0xe]]  ;;  %p603_p5 = pnand %p602_p4, %p596_p1 }
  0x57   :  { %v512_v47 = vpop.eup %511  ;;  %v83_v48 = vadd.f32 %v82_v37, %v60_v33  ;;  %v326_v12 = vadd.f32 %v324_v6, %v319_v1  ;;  %v345_v13 = vmul.f32 %v344_v11, %v667_v0  ;;  %s767_s2 = sld [smem:[#allocation3 + $0xe]]  ;;  %v173_v26 = vstv %s744_s21 }
  0x58   :  { %525 = vrcp.f32 %v169_v42  ;;  %v514_v51 = vpop.eup %513  ;;  %v105_v52 = vmul.f32 %v512_v47, %v104_v41  ;;  %v342_v16 = vadd.f32 %v341_v10, %v338_v2  ;;  %v361_v17 = vstv %s750_s22  ;;  %s770_s1 = sld [smem:[#allocation3 + $0x1d]] }
  0x59   :  { %v192_v57 = vadd.f32 1.0, %v514_v51  ;;  %527 = vpow2.f32 %v468_v53  ;;  %v478_v20 = vmul.f32 -1.442695, %v326_v12  ;;  %v347_v21 = vrot.slane %v345_v13, 1  ;;  %s776_s27 = sld [smem:[#allocation8 + $0x6]] }
  0x5a   :  { %v516_v62 = vpop.eup %515  ;;  %v106_v63 = vadd.f32 %v105_v52, %v83_v48  ;;  %v363_v22 = vstv %s753_s23  ;;  %v367_v25 = vstv %s756_s24  ;;  %s784_s28 = sld [smem:[#allocation8 + $0x7]] }
  0x5b   :  { %529 = vrcp.f32 %v192_v57  ;;  %v518_v3 = vpop.eup %517  ;;  %v128_v4 = vmul.f32 %v516_v62, %v127_v56  ;;  %v364_v24 = vmul.f32 %v363_v22, %v667_v0  ;;  %v349_v27 = vadd.f32 %v347_v21, %v342_v16  ;;  %s464_s29 = sld [smem:[#allocation8 + $0x8]] }
  0x5c   :  { %v215_v9 = vadd.f32 1.0, %v518_v3  ;;  %531 = vpow2.f32 %v473_v5  ;;  %v368_v28 = vmul.f32 %v367_v25, %v667_v0  ;;  %v384_v32 = vstv %s764_s26  ;;  %s469_s30 = sld [smem:[#allocation8 + $0x9]] }
  0x5d   :  { %v520_v14 = vpop.eup %519  ;;  %v129_v15 = vadd.f32 %v128_v4, %v106_v63  ;;  %v365_v31 = vadd.f32 %v364_v24, %v361_v17  ;;  %v483_v35 = vmul.f32 -1.442695, %v349_v27  ;;  %v386_v37 = vstv %s767_s2  ;;  %s474_s6 = sld [smem:[#allocation8 + $0xa]] }
  0x5e   :  { %533 = vrcp.f32 %v215_v9  ;;  %v522_v18 = vpop.eup %521  ;;  %v151_v19 = vmul.f32 %v520_v14, %v150_v8  ;;  %v370_v36 = vrot.slane %v368_v28, 1  ;;  %v387_v39 = vmul.f32 %v386_v37, %v667_v0  ;;  %s479_s7 = sld [smem:[#allocation8 + $0xb]] }
  0x5f   :  { %v238_v23 = vadd.f32 1.0, %v522_v18  ;;  %535 = vpow2.f32 %v478_v20  ;;  %v524_v29 = vpop.eup %523  ;;  %v390_v40 = vstv %s770_s1  ;;  %v196_v41 = vstv %s758_s25  ;;  %s484_s8 = sld [smem:[#allocation8 + $0xc]] }
  0x60   :  { %v152_v30 = vadd.f32 %v151_v19, %v129_v15  ;;  %v261_v34 = vadd.f32 1.0, %v524_v29  ;;  %v372_v42 = vadd.f32 %v370_v36, %v365_v31  ;;  %v391_v43 = vmul.f32 %v390_v40, %v667_v0  ;;  %s489_s9 = sld [smem:[#allocation8 + $0xd]] }
  0x61   :  { %537 = vrcp.f32 %v238_v23  ;;  %v388_v46 = vadd.f32 %v387_v39, %v384_v32  ;;  %v219_v52 = vstv %s776_s27  ;;  %v242_v59 = vstv %s784_s28  ;;  %s494_s3 = sld [smem:[#allocation8 + $0xe]] }
  0x62   :  { %539 = vrcp.f32 %v261_v34  ;;  %v488_v49 = vmul.f32 -1.442695, %v372_v42  ;;  %v393_v50 = vrot.slane %v391_v43, 1  ;;  %v265_v2 = vstv %s464_s29 }
  0x63   :  { %541 = vpow2.f32 %v483_v35  ;;  %v288_v7 = vstv %s469_s30  ;;  %v311_v13 = vstv %s474_s6 }
  0x64   :  { %v395_v53 = vadd.f32 %v393_v50, %v388_v46  ;;  %v334_v19 = vstv %s479_s7 }
  0x65   :  { %v526_v33 = vpop.eup %525  ;;  %v357_v24 = vstv %s484_s8 }
  0x66   :  { %v174_v38 = vmul.f32 %v526_v33, %v173_v26  ;;  %v528_v44 = vpop.eup %527  ;;  %v493_v0 = vmul.f32 -1.442695, %v395_v53  ;;  %v380_v28 = vstv %s489_s9 }
  0x67   :  { %v284_v48 = vadd.f32 1.0, %v528_v44  ;;  %v403_v32 = vstv %s494_s3 }
  0x68   :  { %v175_v45 = vadd.f32 %v174_v38, %v152_v30  ;;  %v530_v47 = vpop.eup %529 }
  0x69   :  { %v197_v51 = vmul.f32 %v530_v47, %v196_v41  ;;  %543 = vrcp.f32 %v284_v48  ;;  %v532_v54 = vpop.eup %531 }
  0x6a   :  { %545 = vpow2.f32 %v488_v49  ;;  %v307_v57 = vadd.f32 1.0, %v532_v54 }
  0x6b   :  { %v198_v55 = vadd.f32 %v197_v51, %v175_v45  ;;  %v534_v56 = vpop.eup %533 }
  0x6c   :  { %v220_v58 = vmul.f32 %v534_v56, %v219_v52  ;;  %547 = vrcp.f32 %v307_v57  ;;  %v536_v60 = vpop.eup %535 }
  0x6d   :  { %549 = vpow2.f32 %v493_v0  ;;  %v330_v63 = vadd.f32 1.0, %v536_v60 }
  0x6e   :  { %v221_v61 = vadd.f32 %v220_v58, %v198_v55  ;;  %v538_v62 = vpop.eup %537 }
  0x6f   :  { %v243_v1 = vmul.f32 %v538_v62, %v242_v59  ;;  %551 = vrcp.f32 %v330_v63  ;;  %v540_v3 = vpop.eup %539 }
  0x70   :  { %v542_v5 = vpop.eup %541  ;;  %v266_v6 = vmul.f32 %v540_v3, %v265_v2 }
  0x71   :  { %v244_v4 = vadd.f32 %v243_v1, %v221_v61  ;;  %v353_v8 = vadd.f32 1.0, %v542_v5 }
  0x73   :  { %v267_v10 = vadd.f32 %v266_v6, %v244_v4  ;;  %553 = vrcp.f32 %v353_v8 }
  0x76   :  { %v544_v9 = vpop.eup %543 }
  0x77   :  { %v546_v11 = vpop.eup %545  ;;  %v289_v12 = vmul.f32 %v544_v9, %v288_v7 }
  0x78   :  { %v376_v14 = vadd.f32 1.0, %v546_v11 }
  0x79   :  { %v548_v15 = vpop.eup %547  ;;  %v290_v16 = vadd.f32 %v289_v12, %v267_v10 }
  0x7a   :  { %555 = vrcp.f32 %v376_v14  ;;  %v550_v17 = vpop.eup %549  ;;  %v312_v18 = vmul.f32 %v548_v15, %v311_v13 }
  0x7b   :  { %v399_v20 = vadd.f32 1.0, %v550_v17 }
  0x7c   :  { %v552_v21 = vpop.eup %551  ;;  %v313_v22 = vadd.f32 %v312_v18, %v290_v16 }
  0x7d   :  { %557 = vrcp.f32 %v399_v20  ;;  %v335_v23 = vmul.f32 %v552_v21, %v334_v19 }
  0x7f   :  { %v336_v25 = vadd.f32 %v335_v23, %v313_v22 }
  0x80   :  { %v554_v26 = vpop.eup %553 }
  0x81   :  { %v358_v27 = vmul.f32 %v554_v26, %v357_v24 }
  0x83   :  { %v359_v29 = vadd.f32 %v358_v27, %v336_v25 }
  0x87   :  { %v556_v30 = vpop.eup %555 }
  0x88   :  { %v381_v31 = vmul.f32 %v556_v30, %v380_v28 }
  0x8a   :  { %v382_v33 = vadd.f32 %v381_v31, %v359_v29  ;;  %v558_v34 = vpop.eup %557 }
  0x8b   :  { %v404_v35 = vmul.f32 %v558_v34, %v403_v32 }
  0x8d   :  { %v405_v36 = vadd.f32 %v404_v35, %v382_v33 }
  0x8f   :  { %406 = vst [vmem:[#allocation9] sm:$0x1] %v405_v36 }
  0x90   :  { %606 = shalt.err (!%p603_p5)
}
  0x91   :  { %416 = dma.vmem_to_hbm [thread:$0]  %s414_s11, 16, %s797_s5, [#allocation4]  }
  0x92   :  { %619 = dma.done.wait [#allocation4], 16  }
  0x93   :  { %620 = vsyncadd [#allocation4], 4294967280 }
  0x94   :  { %420 = vsyncpa [#allocation4], 1 }
  0x95   :  { %421 = vsyncpa [#allocation5], 1 }
  0x96   :  { %422 = vsyncpa [#allocation7], 1 }

</bundles_post_ra>
